<compile_context>
chip_gen: v5e
topology: v5e:2x2
jax: 0.10.0
libtpu: 0.0.40
codegen_flags: <defaults>
</compile_context>

<pallas_src>
import jax
import jax.numpy as jnp
from jax.experimental import pallas as pl
from jax.experimental.pallas import tpu as pltpu


def _round_up(v, m):
    return ((v + m - 1) // m) * m


def _default_n_par():
    """2 grid-parallel chunks only on v7x (2 TensorCores/chip); 1 elsewhere."""
    try:
        kind = jax.devices()[0].device_kind.lower()
    except Exception:
        return 1
    return 2 if "v7" in kind else 1


# ----------------------------------------------------------------------------
# Pallas kernel factory: fused INR-MLP forward + per-sample MSE reduction
#   grid = (n_par, inner); axis 0 "parallel" (megacore), axis 1 reduces over
#   coordinate tiles (VMEM accumulator, init/finalize via pl.when)
# ----------------------------------------------------------------------------
def _build_kernel(B, C, HW, tile, inner, pad_present):
    BC = B * C

    def kernel(coords_ref, x_ref, w1_ref, w2_ref, w3_ref, o_ref, acc_ref):
        t = pl.program_id(1)

        @pl.when(t == 0)
        def _():
            acc_ref[...] = jnp.zeros_like(acc_ref)

        c = coords_ref[...]                                             # (3, T) f32, last row = 1

        # Layer 1 on the MXU, f32, bias folded in; last row of w1a is [0,0,1]
        # so the output carries a constant-one row through the ReLU.
        h = jnp.dot(w1_ref[...], c, preferred_element_type=jnp.float32)   # (hid+1, T)
        h = jnp.maximum(h, 0.0).astype(jnp.bfloat16)

        # Layer 2 on the MXU, bf16 in / f32 acc, bias folded, ones row propagated.
        h = jnp.dot(w2_ref[...], h, preferred_element_type=jnp.float32)   # (hid+1, T)
        h = jnp.maximum(h, 0.0).astype(jnp.bfloat16)

        # Layer 3 on the MXU, bias folded.
        out = jnp.dot(w3_ref[...], h, preferred_element_type=jnp.float32)  # (C, T)

        # Batch path on the VPU: x block is (B*C, T); replicate out across B
        # groups with a cheap sublane tile, then elementwise diff^2 accumulate.
        diff = x_ref[...] - jnp.tile(out, (B, 1))                        # (BC, T)
        sq = diff * diff
        if pad_present:
            start = (pl.program_id(0) * inner + t) * tile
            lane = jax.lax.broadcasted_iota(jnp.int32, (BC, tile), 1)
            sq = jnp.where(start + lane < HW, sq, 0.0)
        acc_ref[...] += sq

        @pl.when(t == pl.num_programs(1) - 1)
        def _():
            s = jnp.sum(acc_ref[...], axis=1, keepdims=True)             # (BC, 1) lane reduce (once)
            o_ref[...] = jnp.broadcast_to(s, o_ref.shape)                # lane-dense (BC, 128)

    return kernel


def model_wrapper_forward(x, coords_t, params, *, max_tile=4096, n_par=None):
    """forward_img(x) with no coordinate sampling -> per-sample MSE, shape (B,)."""
    B, C, H, W = x.shape
    HW = H * W
    if n_par is None:
        n_par = _default_n_par()

    x_flat = x.reshape(B * C, HW).astype(jnp.float32)                    # contiguous, no transpose
    coords_aug = jnp.concatenate(
        [coords_t.astype(jnp.float32), jnp.ones((1, HW), jnp.float32)], axis=0)   # (3, HW)

    w1, b1, w2, b2, w3, b3 = params
    hid = w1.shape[1]
    assert w3.shape[1] == C

    # Homogeneous-coordinate weights: bias column appended; an extra [0..0,1]
    # row keeps a constant-one row alive through ReLU for the next layer's bias.
    w1a = jnp.concatenate(
        [jnp.concatenate([w1.T, b1[:, None]], axis=1),
         jnp.concatenate([jnp.zeros((1, 2), jnp.float32), jnp.ones((1, 1), jnp.float32)], axis=1)],
        axis=0).astype(jnp.float32)                                      # (hid+1, 3) f32
    w2a = jnp.concatenate(
        [jnp.concatenate([w2.T, b2[:, None]], axis=1),
         jnp.concatenate([jnp.zeros((1, hid), jnp.float32), jnp.ones((1, 1), jnp.float32)], axis=1)],
        axis=0).astype(jnp.bfloat16)                                     # (hid+1, hid+1) bf16
    w3a = jnp.concatenate([w3.T, b3[:, None]], axis=1).astype(jnp.bfloat16)  # (C, hid+1) bf16

    # Big lane-aligned tile; pad HW up and mask the tail in-kernel (never shrink
    # the tile below 128-multiples for awkward image sizes).
    tile = min(max_tile, _round_up(-(-HW // n_par), 128))
    tile = max(tile, 128)
    HW_pad = _round_up(HW, tile * n_par)
    inner = HW_pad // (tile * n_par)
    pad = HW_pad - HW
    if pad:
        x_flat = jnp.pad(x_flat, ((0, 0), (0, pad)))
        coords_aug = jnp.pad(coords_aug, ((0, 0), (0, pad)))

    BC = B * C
    kernel = _build_kernel(B, C, HW, tile, inner, pad > 0)

    psums = pl.pallas_call(
        kernel,
        out_shape=jax.ShapeDtypeStruct((n_par, BC, 128), jnp.float32),
        grid_spec=pltpu.PrefetchScalarGridSpec(
            num_scalar_prefetch=0,
            grid=(n_par, inner),
            in_specs=[
                pl.BlockSpec((3, tile), lambda p, t: (0, p * inner + t)),       # coords_aug (3, HWp)
                pl.BlockSpec((BC, tile), lambda p, t: (0, p * inner + t)),      # x (B*C, HWp)
                pl.BlockSpec((hid + 1, 3), lambda p, t: (0, 0)),                # w1a f32
                pl.BlockSpec((hid + 1, hid + 1), lambda p, t: (0, 0)),          # w2a bf16
                pl.BlockSpec((C, hid + 1), lambda p, t: (0, 0)),                # w3a bf16
            ],
            out_specs=pl.BlockSpec((None, BC, 128), lambda p, t: (p, 0, 0)),    # per-core partials
            scratch_shapes=[pltpu.VMEM((BC, tile), jnp.float32)],
        ),
        compiler_params=pltpu.CompilerParams(
            dimension_semantics=("parallel", "arbitrary")),
    )(coords_aug, x_flat, w1a, w2a, w3a)

    # Combine per-parallel-chunk partials, reduce over C, normalize by C*H*W.
    per_bc = jnp.sum(psums[:, :, 0], axis=0)                             # (BC,)
    per_b = per_bc.reshape(B, C).sum(axis=1)                             # (B,)
    return per_b / float(C * HW)


# ----------------------------------------------------------------------------
# Glue: grid construction (shape_to_coords), deterministic params, JAX reference
# ----------------------------------------------------------------------------
def make_grid_t(height, width):
    """meshgrid(linspace(-1,1,H), linspace(-1,1,W), indexing='ij') -> (2, HW)."""
    h = jnp.linspace(-1.0, 1.0, height)
    w = jnp.linspace(-1.0, 1.0, width)
    gh, gw = jnp.meshgrid(h, w, indexing="ij")
    return jnp.stack([gh.reshape(-1), gw.reshape(-1)], axis=0).astype(jnp.float32)


def make_params(key, hidden=32, out_ch=3):
    k1, k2, k3, k4, k5, k6 = jax.random.split(key, 6)
    w1 = jax.random.normal(k1, (2, hidden), jnp.float32) * 0.5
    b1 = jax.random.normal(k4, (hidden,), jnp.float32) * 0.1
    w2 = jax.random.normal(k2, (hidden, hidden), jnp.float32) * (1.0 / jnp.sqrt(hidden))
    b2 = jax.random.normal(k5, (hidden,), jnp.float32) * 0.1
    w3 = jax.random.normal(k3, (hidden, out_ch), jnp.float32) * (1.0 / jnp.sqrt(hidden))
    b3 = jax.random.normal(k6, (out_ch,), jnp.float32) * 0.1
    return (w1, b1, w2, b2, w3, b3)


def reference_forward(x, coords_t, params):
    """Pure-JAX reference emulating kernel numerics (bf16 MXU layers, f32 acc,
    biases of layers 2/3 quantized to bf16 like the folded bias columns)."""
    w1, b1, w2, b2, w3, b3 = params
    B, C, H, W = x.shape
    c = coords_t.T                                                       # (HW, 2)
    h = jnp.dot(c, w1, preferred_element_type=jnp.float32) + b1[None, :]
    h = jnp.maximum(h, 0.0).astype(jnp.bfloat16)
    h = (jnp.dot(h, w2.astype(jnp.bfloat16), preferred_element_type=jnp.float32)
         + b2.astype(jnp.bfloat16).astype(jnp.float32)[None, :])
    h = jnp.maximum(h, 0.0).astype(jnp.bfloat16)
    out = (jnp.dot(h, w3.astype(jnp.bfloat16), preferred_element_type=jnp.float32)
           + b3.astype(jnp.bfloat16).astype(jnp.float32)[None, :])       # (HW, C)
    x_flat = x.reshape(B, C, H * W)
    diff = x_flat - out.T[None]
    return jnp.mean(diff * diff, axis=(1, 2))                            # (B,)


# TODO(synk): the gradncp / random_sample coordinate-subsampling branches and the
# x=None reconstruction branch are host-side control flow; only the default
# full-grid MSE forward path is implemented as the Pallas hot path.

if __name__ == "__main__":
    key = jax.random.PRNGKey(0)
    kx, kp, kx2 = jax.random.split(key, 3)

    # Main case: B=2, C=3, 16x16 image, hidden=32 (coords -> RGB INR).
    B, C, H, W = 2, 3, 16, 16
    x = jax.random.normal(kx, (B, C, H, W), jnp.float32)
    coords_t = make_grid_t(H, W)                       # (2, HW)
    params = make_params(kp, hidden=32, out_ch=C)

    loss = jax.block_until_ready(model_wrapper_forward(x, coords_t, params))
    ref = reference_forward(x, coords_t, params)
    assert loss.shape == (B,)
    assert jnp.allclose(loss, ref, rtol=1e-3, atol=1e-4), (loss, ref)

    # Odd spatial size exercises the pad-and-mask tail path (HW=324 not a
    # multiple of 128).
    H2, W2 = 18, 18
    x2 = jax.random.normal(kx2, (B, C, H2, W2), jnp.float32)
    coords2 = make_grid_t(H2, W2)
    loss2 = jax.block_until_ready(model_wrapper_forward(x2, coords2, params))
    ref2 = reference_forward(x2, coords2, params)
    assert jnp.allclose(loss2, ref2, rtol=1e-3, atol=1e-4), (loss2, ref2)

    # Force the 2-chunk "parallel" path (megacore layout on v7x; still correct
    # as a serial loop on single-TensorCore chips).
    loss3 = jax.block_until_ready(
        model_wrapper_forward(x, coords_t, params, n_par=2))
    assert jnp.allclose(loss3, ref, rtol=1e-3, atol=1e-4), (loss3, ref)

    print("KERNEL_OK")
</pallas_src>

<mosaic_0001>
module attributes {stable_mosaic.version = 11 : i64} {
  func.func @kernel(%arg0: i32, %arg1: i32, %arg2: memref<3x256xf32, #tpu.memory_space<vmem>>, %arg3: memref<6x256xf32, #tpu.memory_space<vmem>>, %arg4: memref<33x3xf32, #tpu.memory_space<vmem>>, %arg5: memref<33x33xbf16, #tpu.memory_space<vmem>>, %arg6: memref<3x33xbf16, #tpu.memory_space<vmem>>, %arg7: memref<1x6x128xf32, #tpu.memory_space<vmem>>, %arg8: memref<6x256xf32, #tpu.memory_space<vmem>>) attributes {dimension_semantics = [#tpu.dimension_semantics<parallel>, #tpu.dimension_semantics<arbitrary>], iteration_bounds = array<i64: 1, 1>, scalar_prefetch = 0 : i64, scratch_operands = 1 : i64, tpu.core_type = #tpu.core_type<tc>, window_params = [{transform_indices = @transform_0, window_bounds = array<i64: 3, 256>}, {transform_indices = @transform_1, window_bounds = array<i64: 6, 256>}, {pipeline_mode = #tpu.pipeline_mode<synchronous>, transform_indices = @transform_2, window_bounds = array<i64: 33, 3>}, {pipeline_mode = #tpu.pipeline_mode<synchronous>, transform_indices = @transform_3, window_bounds = array<i64: 33, 33>}, {pipeline_mode = #tpu.pipeline_mode<synchronous>, transform_indices = @transform_4, window_bounds = array<i64: 3, 33>}, {transform_indices = @transform_5, window_bounds = array<i64: 1, 6, 128>}]} {
    %c0_i32 = arith.constant 0 : i32
    %0 = arith.cmpi eq, %arg1, %c0_i32 : i32
    %1 = arith.extui %0 : i1 to i32
    %c0_i32_0 = arith.constant 0 : i32
    %2 = arith.cmpi ne, %1, %c0_i32_0 : i32
    scf.if %2 {
      %cst_20 = arith.constant 0.000000e+00 : f32
      %26 = vector.broadcast %cst_20 : f32 to vector<6x256xf32>
      %c0_21 = arith.constant 0 : index
      %c0_22 = arith.constant 0 : index
      %27 = vector.load %arg8[%c0_21, %c0_22] : memref<6x256xf32, #tpu.memory_space<vmem>>, vector<6x256xf32>
      tpu.vector_store %arg8[%c0_21, %c0_22], %26 {strides = array<i32>} : memref<6x256xf32, #tpu.memory_space<vmem>>, vector<6x256xf32>,
    } else {
    }
    %c0 = arith.constant 0 : index
    %c0_1 = arith.constant 0 : index
    %3 = vector.load %arg2[%c0, %c0_1] : memref<3x256xf32, #tpu.memory_space<vmem>>, vector<3x256xf32>
    %c0_2 = arith.constant 0 : index
    %c0_3 = arith.constant 0 : index
    %4 = vector.load %arg4[%c0_2, %c0_3] : memref<33x3xf32, #tpu.memory_space<vmem>>, vector<33x3xf32>
    %cst = arith.constant dense<0.000000e+00> : vector<33x256xf32>
    %5 = tpu.matmul %4, %3, %cst {dimension_numbers = #tpu.dot_dimension_numbers<[1], [0], [0], [1], [0, 0, 1, 1], [], []>} : vector<33x3xf32>, vector<3x256xf32>, vector<33x256xf32> -> vector<33x256xf32>
    %cst_4 = arith.constant 0.000000e+00 : f32
    %6 = vector.broadcast %cst_4 : f32 to vector<33x256xf32>
    %7 = arith.maximumf %5, %6 : vector<33x256xf32>
    %8 = arith.truncf %7 : vector<33x256xf32> to vector<33x256xbf16>
    %c0_5 = arith.constant 0 : index
    %c0_6 = arith.constant 0 : index
    %9 = vector.load %arg5[%c0_5, %c0_6] : memref<33x33xbf16, #tpu.memory_space<vmem>>, vector<33x33xbf16>
    %cst_7 = arith.constant dense<0.000000e+00> : vector<33x256xf32>
    %10 = tpu.matmul %9, %8, %cst_7 {dimension_numbers = #tpu.dot_dimension_numbers<[1], [0], [0], [1], [0, 0, 1, 1], [], []>} : vector<33x33xbf16>, vector<33x256xbf16>, vector<33x256xf32> -> vector<33x256xf32>
    %cst_8 = arith.constant 0.000000e+00 : f32
    %11 = vector.broadcast %cst_8 : f32 to vector<33x256xf32>
    %12 = arith.maximumf %10, %11 : vector<33x256xf32>
    %13 = arith.truncf %12 : vector<33x256xf32> to vector<33x256xbf16>
    %c0_9 = arith.constant 0 : index
    %c0_10 = arith.constant 0 : index
    %14 = vector.load %arg6[%c0_9, %c0_10] : memref<3x33xbf16, #tpu.memory_space<vmem>>, vector<3x33xbf16>
    %cst_11 = arith.constant dense<0.000000e+00> : vector<3x256xf32>
    %15 = tpu.matmul %14, %13, %cst_11 {dimension_numbers = #tpu.dot_dimension_numbers<[1], [0], [0], [1], [0, 0, 1, 1], [], []>} : vector<3x33xbf16>, vector<33x256xbf16>, vector<3x256xf32> -> vector<3x256xf32>
    %c0_12 = arith.constant 0 : index
    %c0_13 = arith.constant 0 : index
    %16 = vector.load %arg3[%c0_12, %c0_13] : memref<6x256xf32, #tpu.memory_space<vmem>>, vector<6x256xf32>
    %17 = tpu.concatenate %15, %15 in 0 : vector<3x256xf32>, vector<3x256xf32> -> vector<6x256xf32>
    %18 = arith.subf %16, %17 : vector<6x256xf32>
    %19 = arith.mulf %18, %18 : vector<6x256xf32>
    %c0_14 = arith.constant 0 : index
    %c0_15 = arith.constant 0 : index
    %20 = vector.load %arg8[%c0_14, %c0_15] : memref<6x256xf32, #tpu.memory_space<vmem>>, vector<6x256xf32>
    %21 = arith.addf %20, %19 : vector<6x256xf32>
    %c0_16 = arith.constant 0 : index
    %c0_17 = arith.constant 0 : index
    %22 = vector.load %arg8[%c0_16, %c0_17] : memref<6x256xf32, #tpu.memory_space<vmem>>, vector<6x256xf32>
    tpu.vector_store %arg8[%c0_16, %c0_17], %21 {strides = array<i32>} : memref<6x256xf32, #tpu.memory_space<vmem>>, vector<6x256xf32>,
    %c0_i32_18 = arith.constant 0 : i32
    %23 = arith.cmpi eq, %arg1, %c0_i32_18 : i32
    %24 = arith.extui %23 : i1 to i32
    %c0_i32_19 = arith.constant 0 : i32
    %25 = arith.cmpi ne, %24, %c0_i32_19 : i32
    scf.if %25 {
      %c0_20 = arith.constant 0 : index
      %c0_21 = arith.constant 0 : index
      %26 = vector.load %arg8[%c0_20, %c0_21] : memref<6x256xf32, #tpu.memory_space<vmem>>, vector<6x256xf32>
      %cst_22 = arith.constant dense<0.000000e+00> : vector<6xf32>
      %27 = vector.multi_reduction <add>, %26, %cst_22 [1] : vector<6x256xf32> to vector<6xf32>
      %28 = vector.shape_cast %27 : vector<6xf32> to vector<6x1xf32>
      %29 = vector.shape_cast %28 : vector<6x1xf32> to vector<6x1xf32>
      %30 = vector.broadcast %29 : vector<6x1xf32> to vector<6x128xf32>
      %c0_23 = arith.constant 0 : index
      %c0_24 = arith.constant 0 : index
      %c0_25 = arith.constant 0 : index
      %31 = vector.load %arg7[%c0_23, %c0_24, %c0_25] : memref<1x6x128xf32, #tpu.memory_space<vmem>>, vector<1x6x128xf32>
      %32 = vector.shape_cast %31 : vector<1x6x128xf32> to vector<6x128xf32>
      %33 = vector.shape_cast %30 : vector<6x128xf32> to vector<1x6x128xf32>
      tpu.vector_store %arg7[%c0_23, %c0_24, %c0_25], %33 {strides = array<i32>} : memref<1x6x128xf32, #tpu.memory_space<vmem>>, vector<1x6x128xf32>,
    } else {
    }
    return
  }
  func.func @transform_0(%arg0: i32, %arg1: i32) -> (i32, i32) {
    %c1_i32 = arith.constant 1 : i32
    %0 = arith.muli %arg0, %c1_i32 : i32
    %1 = arith.addi %0, %arg1 : i32
    %c0_i32 = arith.constant 0 : i32
    %c0_i32_0 = arith.constant 0 : i32
    return %c0_i32, %1 : i32, i32
  }
  func.func @transform_1(%arg0: i32, %arg1: i32) -> (i32, i32) {
    %c1_i32 = arith.constant 1 : i32
    %0 = arith.muli %arg0, %c1_i32 : i32
    %1 = arith.addi %0, %arg1 : i32
    %c0_i32 = arith.constant 0 : i32
    %c0_i32_0 = arith.constant 0 : i32
    return %c0_i32, %1 : i32, i32
  }
  func.func @transform_2(%arg0: i32, %arg1: i32) -> (i32, i32) {
    %c0_i32 = arith.constant 0 : i32
    %c0_i32_0 = arith.constant 0 : i32
    %c0_i32_1 = arith.constant 0 : i32
    return %c0_i32, %c0_i32_0 : i32, i32
  }
  func.func @transform_3(%arg0: i32, %arg1: i32) -> (i32, i32) {
    %c0_i32 = arith.constant 0 : i32
    %c0_i32_0 = arith.constant 0 : i32
    %c0_i32_1 = arith.constant 0 : i32
    return %c0_i32, %c0_i32_0 : i32, i32
  }
  func.func @transform_4(%arg0: i32, %arg1: i32) -> (i32, i32) {
    %c0_i32 = arith.constant 0 : i32
    %c0_i32_0 = arith.constant 0 : i32
    %c0_i32_1 = arith.constant 0 : i32
    return %c0_i32, %c0_i32_0 : i32, i32
  }
  func.func @transform_5(%arg0: i32, %arg1: i32) -> (i32, i32, i32) {
    %c0_i32 = arith.constant 0 : i32
    %c0_i32_0 = arith.constant 0 : i32
    %c0_i32_1 = arith.constant 0 : i32
    return %arg0, %c0_i32, %c0_i32_0 : i32, i32, i32
  }
}

</mosaic_0001>

<bundles_post_ra>
// kernel: tpu_custom_call.1
= control target key start
LH: loop header
LB: loop body
LE: loop exit
PB: predicated region body
PF: predicated region fallthrough
CT: control target
= control target key end

     0   :  { %vm97_vm0 = vcmask 1042432   ;;  %vm81_vm1 = vcmask 23552   ;;  %vm210_vm2 = vcmask 1040384   ;;  %v397_v20 = vmov 0   ;;  %s490_s0 = inlined_call_operand.vmem [shape: f32[3,256], index: 0, kind: input, shape index: {}]   ;;  %s491_s2 = inlined_call_operand.vmem [shape: f32[33,3], index: 2, kind: input, shape index: {}]   ;;  %s492_s3 = inlined_call_operand.vmem [shape: bf16[33,33], index: 3, kind: input, shape index: {}]   ;;  %s493_s4 = inlined_call_operand.vmem [shape: bf16[3,33], index: 4, kind: input, shape index: {}]   ;;  %s494_s1 = inlined_call_operand.vmem [shape: f32[6,256], index: 1, kind: input, shape index: {}]   ;;  %s495_s5 = inlined_call_operand.vmem [shape: f32[1,6,128], index: 5, kind: output, shape index: {}]  }
   0x1   :  { %v71_v0 = vld [vmem:[%s490_s0] sm:$0x77]  ;;  %v73_v4 = vld [vmem:[%s491_s2 + $0x8] sm:$0xff]  ;;  %v74_v5 = vld [vmem:[%s491_s2 + $0x10] sm:$0xff]  ;;  %v212_v21 = vsel %vm210_vm2, 65535, %v397_v20  ;;  %vm200_vm3 = vcmask 269312  }
   0x2   :  { %78 = vst [vmem:[#allocation1] ss:$2 sm:$0xff] %v71_v0  ;;  %v72_v1 = vld [vmem:[%s491_s2] sm:$0xff]  ;;  %v75_v6 = vld [vmem:[%s491_s2 + $0x18] sm:$0xff]  ;;  %v394_v39 = vld [vmem:[%s492_s3 + $0x8] sm:$0xff]  ;;  %v398_v49 = vmov 0.0  }
   0x3   :  { %v76_v7 = vld [vmem:[%s491_s2 + $0x20] sm:$0x1]  ;;  %v186_v40 = vld [vmem:[%s492_s3 + $0x10] sm:$0x1]  ;;  %69 = vst [vmem:[#allocation2] sm:$0x3f] %v398_v49 }
   0x4   :  { %v393_v38 = vld [vmem:[%s492_s3] sm:$0xff]  ;;  %v196_v41 = vunpack.c.l.b16 %v186_v40  ;;  %70 = vst [vmem:[#allocation2 + $0x8] sm:$0x3f] %v398_v49  ;;  %vm342_vm4 = vcmask 1045504  }
   0x6   :  { %v199_v42 = vpack.c.b16 %v196_v41, %v196_v41 }
   0x9   :  { %v79_v2 = vld.sshfl [vmem:[#allocation1] sm:$0xff pattern:$0x75316420]  ;;  %v80_v3 = vld.sshfl [vmem:[#allocation1 + $0x8] sm:$0xff pattern:$0x75316420] }
   0xa   :  { %365 = vmatpush.msk.msra.mxu0 %vm97_vm0, %v79_v2  ;;  %371 = vmatpush.msk.msra.mxu1 %vm97_vm0, %v80_v3 }
   0xb   :  { %366 = vmatmul.msk.f32.vlgmr.msra.gmra.mxu0 %vm81_vm1, %v72_v1  ;;  %372 = vmatmul.msk.f32.vlgmr.msra.gmra.mxu1 %vm81_vm1, %v72_v1 }
  0x13   :  { %367 = vmatmul.msk.f32.gmra.mxu0 %vm81_vm1, %v73_v4  ;;  %373 = vmatmul.msk.f32.gmra.mxu1 %vm81_vm1, %v73_v4 }
  0x1b   :  { %368 = vmatmul.msk.f32.gmra.mxu0 %vm81_vm1, %v74_v5  ;;  %374 = vmatmul.msk.f32.gmra.mxu1 %vm81_vm1, %v74_v5 }
  0x23   :  { %369 = vmatmul.msk.f32.gmra.mxu0 %vm81_vm1, %v75_v6  ;;  %375 = vmatmul.msk.f32.gmra.mxu1 %vm81_vm1, %v75_v6 }
  0x2b   :  { %370 = vmatmul.msk.f32.gmra.mxu0 %vm81_vm1, %v76_v7  ;;  %376 = vmatmul.msk.f32.gmra.mxu1 %vm81_vm1, %v76_v7 }
  0x88   :  { %v119_v8 = vpop.f32.mrf.mxu0  ;;  %v151_v9 = vpop.f32.mrf.mxu1 }
  0x89   :  { %v166_v34 = vmax.f32 %v119_v8, 0.0  ;;  %v167_v35 = vmax.f32 %v151_v9, 0.0 }
  0x90   :  { %v122_v10 = vpop.f32.mrf.mxu0  ;;  %v154_v11 = vpop.f32.mrf.mxu1 }
  0x91   :  { %v168_v30 = vmax.f32 %v122_v10, 0.0  ;;  %v169_v31 = vmax.f32 %v154_v11, 0.0  ;;  %v281_v10 = vld [vmem:[%s493_s4] sm:$0x3] }
  0x93   :  { %v176_v36 = vpack.c.bf16 %v168_v30, %v166_v34  ;;  %v177_v37 = vpack.c.bf16 %v169_v31, %v167_v35 }
  0x98   :  { %v125_v12 = vpop.f32.mrf.mxu0  ;;  %v157_v13 = vpop.f32.mrf.mxu1 }
  0x99   :  { %v170_v28 = vmax.f32 %v125_v12, 0.0  ;;  %v171_v29 = vmax.f32 %v157_v13, 0.0  ;;  %v317_v13 = vld [vmem:[%s494_s1] sm:$0x3f] }
  0xa0   :  { %v128_v14 = vpop.f32.mrf.mxu0  ;;  %v160_v15 = vpop.f32.mrf.mxu1 }
  0xa1   :  { %v172_v24 = vmax.f32 %v128_v14, 0.0  ;;  %v173_v25 = vmax.f32 %v160_v15, 0.0  ;;  %v318_v15 = vld [vmem:[%s494_s1 + $0x8] sm:$0x3f] }
  0xa3   :  { %v178_v32 = vpack.c.bf16 %v172_v24, %v170_v28  ;;  %v179_v33 = vpack.c.bf16 %v173_v25, %v171_v29 }
  0xa8   :  { %v131_v16 = vpop.f32.mrf.mxu0  ;;  %v163_v17 = vpop.f32.mrf.mxu1 }
  0xa9   :  { %v174_v18 = vmax.f32 %v131_v16, 0.0  ;;  %v175_v19 = vmax.f32 %v163_v17, 0.0 }
  0xab   :  { %v180_v22 = vpack.c.bf16 %v174_v18, %v174_v18  ;;  %v181_v23 = vpack.c.bf16 %v175_v19, %v175_v19 }
  0xad   :  { %v214_v26 = vand.u32 %v212_v21, %v180_v22  ;;  %v217_v27 = vand.u32 %v212_v21, %v181_v23  ;;  %v332_v22 = vld [vmem:[#allocation2 + $0x8] sm:$0x3f] }
  0xaf   :  { %224 = vmatpush.bf16.msra.mxu2 %v214_v26  ;;  %247 = vmatpush.bf16.msra.mxu3 %v217_v27 }
  0xb3   :  { %225 = vmatpush.bf16.msra.mxu2 %v178_v32  ;;  %248 = vmatpush.bf16.msra.mxu3 %v179_v33 }
  0xb7   :  { %226 = vmatpush.bf16.msra.mxu2 %v176_v36  ;;  %249 = vmatpush.bf16.msra.mxu3 %v177_v37 }
  0xba   :  { %385 = vmatmul.msk.bf16.vlgmr.msra.gmra.mxu2 %vm200_vm3, %v393_v38  ;;  %388 = vmatmul.msk.bf16.vlgmr.msra.gmra.mxu3 %vm200_vm3, %v393_v38 }
  0xca   :  { %386 = vmatmul.msk.bf16.gmra.mxu2 %vm200_vm3, %v394_v39  ;;  %389 = vmatmul.msk.bf16.gmra.mxu3 %vm200_vm3, %v394_v39 }
  0xda   :  { %387 = vmatmul.msk.bf16.gmra.mxu2 %vm200_vm3, %v199_v42  ;;  %390 = vmatmul.msk.bf16.gmra.mxu3 %vm200_vm3, %v199_v42 }
 0x13d   :  { %v228_v43 = vpop.f32.mrf.mxu2  ;;  %v251_v44 = vpop.f32.mrf.mxu3 }
 0x13e   :  { %v265_v6 = vmax.f32 %v228_v43, 0.0  ;;  %v266_v7 = vmax.f32 %v251_v44, 0.0 }
 0x145   :  { %v230_v45 = vpop.f32.mrf.mxu2  ;;  %v253_v46 = vpop.f32.mrf.mxu3 }
 0x146   :  { %v267_v2 = vmax.f32 %v230_v45, 0.0  ;;  %v268_v3 = vmax.f32 %v253_v46, 0.0 }
 0x148   :  { %v275_v8 = vpack.c.bf16 %v267_v2, %v265_v6  ;;  %v276_v9 = vpack.c.bf16 %v268_v3, %v266_v7 }
 0x14d   :  { %v233_v47 = vpop.f32.mrf.mxu2  ;;  %v256_v48 = vpop.f32.mrf.mxu3 }
 0x14e   :  { %v269_v62 = vmax.f32 %v233_v47, 0.0  ;;  %v270_v63 = vmax.f32 %v256_v48, 0.0 }
 0x155   :  { %v235_v50 = vpop.f32.mrf.mxu2  ;;  %v258_v51 = vpop.f32.mrf.mxu3 }
 0x156   :  { %v271_v58 = vmax.f32 %v235_v50, 0.0  ;;  %v272_v59 = vmax.f32 %v258_v51, 0.0 }
 0x158   :  { %v277_v4 = vpack.c.bf16 %v271_v58, %v269_v62  ;;  %v278_v5 = vpack.c.bf16 %v272_v59, %v270_v63 }
 0x15d   :  { %v238_v52 = vpop.f32.mrf.mxu2  ;;  %v261_v53 = vpop.f32.mrf.mxu3 }
 0x15e   :  { %v273_v54 = vmax.f32 %v238_v52, 0.0  ;;  %v274_v55 = vmax.f32 %v261_v53, 0.0 }
 0x160   :  { %v279_v56 = vpack.c.bf16 %v273_v54, %v273_v54  ;;  %v280_v57 = vpack.c.bf16 %v274_v55, %v274_v55 }
 0x162   :  { %v286_v60 = vand.u32 %v279_v56, %v212_v21  ;;  %v289_v61 = vand.u32 %v280_v57, %v212_v21  ;;  %v331_v21 = vld [vmem:[#allocation2] sm:$0x3f] }
 0x164   :  { %296 = vmatpush.bf16.msrb.mxu0 %v286_v60  ;;  %309 = vmatpush.bf16.msrb.mxu1 %v289_v61 }
 0x165   :  { %v240_v0 = vpop.f32.mrf.mxu2  ;;  %v263_v1 = vpop.f32.mrf.mxu3 }
 0x168   :  { %297 = vmatpush.bf16.msrb.mxu0 %v277_v4  ;;  %310 = vmatpush.bf16.msrb.mxu1 %v278_v5 }
 0x16c   :  { %298 = vmatpush.bf16.msrb.mxu0 %v275_v8  ;;  %311 = vmatpush.bf16.msrb.mxu1 %v276_v9 }
 0x16f   :  { %391 = vmatmul.msk.bf16.vlgmr.msrb.gmra.mxu0 %vm200_vm3, %v281_v10  ;;  %392 = vmatmul.msk.bf16.vlgmr.msrb.gmra.mxu1 %vm200_vm3, %v281_v10 }
 0x1ec   :  { %v300_v11 = vpop.f32.mrf.mxu0  ;;  %v313_v12 = vpop.f32.mrf.mxu1 }
 0x1ed   :  { %v321_v14 = vrot.slane %v300_v11, 5  ;;  %v322_v16 = vrot.slane %v313_v12, 5 }
 0x1ef   :  { %v325_v17 = vsel %vm97_vm0, %v300_v11, %v321_v14  ;;  %v326_v18 = vsel %vm97_vm0, %v313_v12, %v322_v16 }
 0x1f0   :  { %v327_v19 = vsub.f32 %v317_v13, %v325_v17  ;;  %v328_v20 = vsub.f32 %v318_v15, %v326_v18 }
 0x1f2   :  { %v329_v23 = vmul.f32 %v327_v19, %v327_v19  ;;  %v330_v24 = vmul.f32 %v328_v20, %v328_v20 }
 0x1f4   :  { %v333_v25 = vadd.f32 %v331_v21, %v329_v23  ;;  %v334_v26 = vadd.f32 %v332_v22, %v330_v24  ;;  %v302_v27 = vpop.f32.mrf.mxu0  ;;  %v315_v28 = vpop.f32.mrf.mxu1 }
 0x1f6   :  { %335 = vst [vmem:[#allocation2] sm:$0x3f] %v333_v25 }
 0x1f7   :  { %336 = vst [vmem:[#allocation2 + $0x8] sm:$0x3f] %v334_v26 }
 0x1fd   :  { %v340_v29 = vld [vmem:[#allocation2] sm:$0x3f] }
 0x1fe   :  { %v341_v30 = vld [vmem:[#allocation2 + $0x8] sm:$0x3f]  ;;  %v343_v31 = vsel %vm342_vm4, %v340_v29, 0.0 }
 0x1ff   :  { %v344_v32 = vsel %vm342_vm4, %v341_v30, 0.0 }
 0x200   :  { %v345_v33 = vadd.f32 %v344_v32, %v343_v31 }
 0x202   :  { %346 = vadd.xlane.f32.xlu0 %v345_v33 }
 0x275   :  { %v347_v34 = vpop.xlane.xlu0 %346 }
 0x276   :  { %348 = vst [vmem:[%s495_s5] sm:$0x3f] %v347_v34 }

</bundles_post_ra>
